<compile_context>
chip_gen: v7x
topology: tpu7x:2x2x1
jax: 0.10.0
libtpu: 0.0.40
codegen_flags: <defaults>
</compile_context>

<pallas_src>
import itertools

import numpy as np
import jax
import jax.numpy as jnp
from jax import lax
from jax.experimental import pallas as pl
from jax.experimental.pallas import tpu as pltpu  # noqa: F401  (TPU backend)

# ----------------------------- hyper-parameters ------------------------------
NUM_CLASSES = 4
WEIGHT_CLASS = 1.0
WEIGHT_BBOX = 5.0
WEIGHT_GIOU = 2.0
NO_OBJECT_WEIGHT = 0.1

B = 2            # batch
Q = 8            # num queries
C1 = NUM_CLASSES + 1
O = 2            # decoder layers (layerwise outputs)

LANES = 128      # TPU lane width: class axis and matched-pair axis pad to this
M_PAD = 128      # padded count of matched (query, target) pairs (lane-dense)
NEG_INF = -1e30  # finite "-inf" for class-lane padding (avoids 0*inf -> NaN)
EPS = 1e-7

DUMMY_BOX = np.array([0.5, 0.5, 0.2, 0.2], dtype=np.float32)  # valid filler box


# --------------------------------- kernel ------------------------------------
def _sum_last2(x):
    """Sum over lane axis then sublane axis, keeping both as size 1."""
    return jnp.sum(jnp.sum(x, axis=2, keepdims=True), axis=1, keepdims=True)


def detr_loss_kernel(logits_ref, w1h_ref, boxes_ref, mask_ref, out_ref):
    """All decoder layers fused into one invocation (no grid).

    logits_ref : [O, B*Q, 128] f32  class logits, lanes >= C1 padded with -1e30
    w1h_ref    : [O, B*Q, 128] f32  class-weighted one-hot targets (0 on pads)
    boxes_ref  : [O, 8, M_PAD] f32  matched boxes (cxcywh); pred rows 0-3,
                                    target rows 4-7; matched pairs on lanes
    mask_ref   : [O, 1, M_PAD] f32  (1/num_bboxes) on real matched pairs, else 0
    out_ref    : [O, 8, 128]   f32  [o,0,0]=loss_bboxes  [o,0,1]=loss_giou
                                    [o,0,2]=ce           [*,1,0]=total loss
    """
    # ---- weighted cross-entropy (weighted mean over all (b, q) positions) ----
    logits = logits_ref[...]
    w1h = w1h_ref[...]
    m = jnp.max(logits, axis=-1, keepdims=True)
    z = logits - m
    lse = jnp.log(jnp.sum(jnp.exp(z), axis=-1, keepdims=True))
    logp = z - lse                                       # [O, BQ, 128]
    ce_num = _sum_last2(w1h * (-logp))                   # [O, 1, 1]
    ce_den = _sum_last2(w1h)                             # [O, 1, 1]  (> 0)
    ce = ce_num / ce_den

    # ---- L1 loss on matched boxes (mask already carries 1/num_bboxes) -------
    boxes = boxes_ref[...]
    mask = mask_ref[...]                                 # [O, 1, M]
    pb = boxes[:, 0:4, :]                                # pred   cxcywh
    tb = boxes[:, 4:8, :]                                # target cxcywh
    loss_bboxes = _sum_last2(jnp.abs(pb - tb) * mask)    # [O, 1, 1]

    # ---- GIoU loss (cxcywh -> xyxy), eps-guarded divisions ------------------
    pcx, pcy, pw, ph = pb[:, 0:1, :], pb[:, 1:2, :], pb[:, 2:3, :], pb[:, 3:4, :]
    tcx, tcy, tw, th = tb[:, 0:1, :], tb[:, 1:2, :], tb[:, 2:3, :], tb[:, 3:4, :]
    px1, py1 = pcx - 0.5 * pw, pcy - 0.5 * ph
    px2, py2 = pcx + 0.5 * pw, pcy + 0.5 * ph
    tx1, ty1 = tcx - 0.5 * tw, tcy - 0.5 * th
    tx2, ty2 = tcx + 0.5 * tw, tcy + 0.5 * th

    area_p = (px2 - px1) * (py2 - py1)
    area_t = (tx2 - tx1) * (ty2 - ty1)
    inter_w = jnp.maximum(jnp.minimum(px2, tx2) - jnp.maximum(px1, tx1), 0.0)
    inter_h = jnp.maximum(jnp.minimum(py2, ty2) - jnp.maximum(py1, ty1), 0.0)
    inter = inter_w * inter_h
    union = area_p + area_t - inter
    iou = inter / (union + EPS)
    enc_w = jnp.maximum(px2, tx2) - jnp.minimum(px1, tx1)
    enc_h = jnp.maximum(py2, ty2) - jnp.minimum(py1, ty1)
    area_c = enc_w * enc_h
    giou = iou - (area_c - union) / (area_c + EPS)
    loss_giou = _sum_last2((1.0 - giou) * mask)          # [O, 1, 1]

    # ---- fused scalar epilogue: per-layer terms + weighted total ------------
    per_layer = (WEIGHT_BBOX * loss_bboxes + WEIGHT_CLASS * ce
                 + WEIGHT_GIOU * loss_giou)              # [O, 1, 1]
    total = jnp.sum(per_layer)                           # scalar

    sub = lax.broadcasted_iota(jnp.int32, out_ref.shape, 1)
    lane = lax.broadcasted_iota(jnp.int32, out_ref.shape, 2)
    out_ref[...] = (jnp.where((sub == 0) & (lane == 0), loss_bboxes, 0.0)
                    + jnp.where((sub == 0) & (lane == 1), loss_giou, 0.0)
                    + jnp.where((sub == 0) & (lane == 2), ce, 0.0)
                    + jnp.where((sub == 1) & (lane == 0), total, 0.0))


# ------------------- device-side matcher cost matrices (jnp) -----------------
def _cxcywh_to_xyxy(bx):
    cx, cy, w, h = bx[..., 0], bx[..., 1], bx[..., 2], bx[..., 3]
    return jnp.stack([cx - 0.5 * w, cy - 0.5 * h, cx + 0.5 * w, cy + 0.5 * h],
                     axis=-1)


def _cost_matrices(logits, boxes, tgt_boxes, tgt_labels):
    """Matching cost for every (layer, image, query, target) at once.

    logits [O,B,Q,C1], boxes [O,B,Q,4] cxcywh, tgt_boxes [B,T,4], tgt_labels [B,T]
    -> costs [O,B,Q,T]
    """
    o, b, q, _ = logits.shape
    t = tgt_labels.shape[-1]

    prob = jax.nn.softmax(logits, axis=-1)
    idx = jnp.broadcast_to(tgt_labels[None, :, None, :], (o, b, q, t))
    cost_class = -jnp.take_along_axis(prob, idx, axis=-1)                 # [O,B,Q,T]

    cost_bbox = jnp.sum(
        jnp.abs(boxes[:, :, :, None, :] - tgt_boxes[None, :, None, :, :]),
        axis=-1)                                                          # [O,B,Q,T]

    pb = _cxcywh_to_xyxy(boxes)                                           # [O,B,Q,4]
    tb = _cxcywh_to_xyxy(tgt_boxes)                                       # [B,T,4]
    area_p = (pb[..., 2] - pb[..., 0]) * (pb[..., 3] - pb[..., 1])        # [O,B,Q]
    area_t = (tb[..., 2] - tb[..., 0]) * (tb[..., 3] - tb[..., 1])        # [B,T]
    lt = jnp.maximum(pb[:, :, :, None, :2], tb[None, :, None, :, :2])
    rb = jnp.minimum(pb[:, :, :, None, 2:], tb[None, :, None, :, 2:])
    wh = jnp.maximum(rb - lt, 0.0)
    inter = wh[..., 0] * wh[..., 1]
    union = area_p[..., None] + area_t[None, :, None, :] - inter
    iou = inter / (union + EPS)
    lt_c = jnp.minimum(pb[:, :, :, None, :2], tb[None, :, None, :, :2])
    rb_c = jnp.maximum(pb[:, :, :, None, 2:], tb[None, :, None, :, 2:])
    wh_c = jnp.maximum(rb_c - lt_c, 0.0)
    area_c = wh_c[..., 0] * wh_c[..., 1]
    giou = iou - (area_c - union) / (area_c + EPS)
    cost_giou = -giou

    return (WEIGHT_BBOX * cost_bbox + WEIGHT_CLASS * cost_class
            + WEIGHT_GIOU * cost_giou)


# ---------------- single fused device call: matching + loss ------------------
@jax.jit
def _detr_loss_device(class_logits_all, boxes_all, tgt_boxes, tgt_labels,
                      tgt_valid, perm_table):
    """Matching (exact brute-force) + DETR loss, all on device, one dispatch."""
    o, b, q, c1 = class_logits_all.shape
    t = tgt_labels.shape[-1]
    bq = b * q
    bt = b * t

    # ---- matcher cost; invalid (padded) target columns contribute 0 ---------
    cost = _cost_matrices(class_logits_all, boxes_all, tgt_boxes, tgt_labels)
    cost = cost * tgt_valid[None, :, None, :]                           # [O,B,Q,T]

    # ---- exact assignment: argmin over all P(Q, T) permutations -------------
    perm_oh = jax.nn.one_hot(perm_table, q, dtype=jnp.float32)          # [P,T,Q]
    perm_cost = jnp.einsum('obqt,ptq->obp', cost, perm_oh)              # [O,B,P]
    best = jnp.argmin(perm_cost, axis=-1)                               # [O,B]
    src_q = perm_table[best]                                            # [O,B,T]

    # ---- gather matched boxes; pack pred (rows 0-3) + tgt (rows 4-7) --------
    idx = jnp.broadcast_to(src_q[..., None], (o, b, t, 4))
    pred_m = jnp.take_along_axis(boxes_all, idx, axis=2)                # [O,B,T,4]
    tgt_m = jnp.broadcast_to(tgt_boxes[None], (o, b, t, 4))             # [O,B,T,4]
    pred_lanes = jnp.transpose(pred_m.reshape(o, bt, 4), (0, 2, 1))     # [O,4,BT]
    tgt_lanes = jnp.transpose(tgt_m.reshape(o, bt, 4), (0, 2, 1))       # [O,4,BT]
    boxes_packed = jnp.concatenate([pred_lanes, tgt_lanes], axis=1)     # [O,8,BT]
    boxes_packed = jnp.pad(boxes_packed, ((0, 0), (0, 0), (0, M_PAD - bt)))

    # ---- pair mask with 1/num_bboxes folded in (fused epilogue) -------------
    num_bboxes = jnp.maximum(jnp.sum(tgt_valid), 1.0)
    pair_mask = jnp.broadcast_to(tgt_valid[None], (o, b, t)).reshape(o, 1, bt)
    pair_mask = jnp.pad(pair_mask, ((0, 0), (0, 0), (0, M_PAD - bt)))
    mask_scaled = pair_mask / num_bboxes                                # [O,1,M_PAD]

    # ---- class-weighted one-hot targets [O, B*Q, 128] ------------------------
    match_oh = jax.nn.one_hot(src_q, q, dtype=jnp.float32)              # [O,B,T,Q]
    match_oh = match_oh * tgt_valid[None, :, :, None]
    lbl_oh = jax.nn.one_hot(tgt_labels, LANES, dtype=jnp.float32)       # [B,T,128]
    matched_cls = jnp.einsum('obtq,btc->obqc', match_oh, lbl_oh)        # [O,B,Q,128]
    is_matched = jnp.sum(match_oh, axis=2)                              # [O,B,Q]
    noobj_oh = jax.nn.one_hot(jnp.array(NUM_CLASSES), LANES, dtype=jnp.float32)
    cls_oh = matched_cls + (1.0 - is_matched)[..., None] * noobj_oh
    w_vec = jnp.concatenate([jnp.ones((NUM_CLASSES,), jnp.float32),
                             jnp.full((1,), NO_OBJECT_WEIGHT, jnp.float32),
                             jnp.zeros((LANES - c1,), jnp.float32)])
    w_onehot = (cls_oh * w_vec).reshape(o, bq, LANES)

    # ---- lane-padded logits ---------------------------------------------------
    logits_p = jnp.pad(class_logits_all.reshape(o, bq, c1),
                       ((0, 0), (0, 0), (0, LANES - c1)),
                       constant_values=NEG_INF)

    # ---- one Pallas invocation for all layers (no grid, full-array blocks) ---
    flops = o * (10 * bq * LANES + 64 * M_PAD)
    transcendentals = o * bq * LANES
    bytes_accessed = 4 * (2 * o * bq * LANES + 9 * o * M_PAD + 8 * o * LANES)
    terms = pl.pallas_call(
        detr_loss_kernel,
        out_shape=jax.ShapeDtypeStruct((o, 8, LANES), jnp.float32),
        cost_estimate=pl.CostEstimate(flops=flops,
                                      transcendentals=transcendentals,
                                      bytes_accessed=bytes_accessed),
    )(logits_p, w_onehot, boxes_packed, mask_scaled)

    loss_bboxes = terms[:, 0, 0]
    loss_giou = terms[:, 0, 1]
    ce = terms[:, 0, 2]
    total = terms[0, 1, 0]
    return total, loss_bboxes, loss_giou, ce


# ------------------------------ host wrapper ---------------------------------
def detr_loss_forward(class_logits_all, boxes_all, targets):
    """DETR loss over O decoder layers. Matching + loss in ONE device dispatch;
    the only host transfer is the final per-layer scalars for loss_dict."""
    class_logits_all = np.asarray(class_logits_all, dtype=np.float32)
    boxes_all = np.asarray(boxes_all, dtype=np.float32)
    o, b, q, _ = class_logits_all.shape

    # ---- pad targets (host-side data anyway; no device sync involved) -------
    counts = [len(t["labels"]) for t in targets]
    t_max = max(max(counts) if counts else 0, 1)
    assert t_max <= q, "more targets than queries is not supported"
    assert b * t_max <= M_PAD, "too many matched pairs for M_PAD"
    tgt_boxes_pad = np.tile(DUMMY_BOX, (b, t_max, 1)).astype(np.float32)
    tgt_labels_pad = np.zeros((b, t_max), dtype=np.int32)
    tgt_valid = np.zeros((b, t_max), dtype=np.float32)
    for bi, tgt in enumerate(targets):
        n = counts[bi]
        if n:
            tgt_boxes_pad[bi, :n] = tgt["boxes_cxcywh"]
            tgt_labels_pad[bi, :n] = tgt["labels"]
            tgt_valid[bi, :n] = 1.0

    # static table of all P(Q, t_max) candidate assignments (tiny for Q=8)
    perm_table = np.asarray(list(itertools.permutations(range(q), t_max)),
                            dtype=np.int32)                          # [P, t_max]

    total, lb, lg, lce = _detr_loss_device(
        jnp.asarray(class_logits_all),
        jnp.asarray(boxes_all),
        jnp.asarray(tgt_boxes_pad),
        jnp.asarray(tgt_labels_pad),
        jnp.asarray(tgt_valid),
        jnp.asarray(perm_table))

    # ---- single host sync for the scalar loss_dict ---------------------------
    lb, lg, lce = jax.device_get((lb, lg, lce))
    loss_dict = {}
    for i in range(o):
        loss_dict[f"layer_{i}/bboxes_l1"] = float(lb[i])
        loss_dict[f"layer_{i}/bbox_giou"] = float(lg[i])
        loss_dict[f"layer_{i}/classification_ce"] = float(lce[i])
    return total, loss_dict


# ----------------------------------- main -------------------------------------
if __name__ == "__main__":
    key = jax.random.PRNGKey(0)
    k_logits, k_boxes, k_tgt, k_lab = jax.random.split(key, 4)

    # Synthetic DETR outputs: O layers, batch B, Q queries.
    class_logits_all = jax.random.normal(k_logits, (O, B, Q, C1),
                                         dtype=jnp.float32)
    boxes_all = jax.nn.sigmoid(
        jax.random.normal(k_boxes, (O, B, Q, 4), dtype=jnp.float32))

    # Synthetic ground-truth targets (3 boxes for image 0, 2 for image 1).
    num_targets = [3, 2]
    targets = []
    tk = k_tgt
    for bi in range(B):
        tk, ka, kb = jax.random.split(tk, 3)
        t = num_targets[bi]
        centers = jax.random.uniform(ka, (t, 2), minval=0.2, maxval=0.8)
        sizes = jax.random.uniform(kb, (t, 2), minval=0.1, maxval=0.3)
        labels = jax.random.randint(jax.random.fold_in(k_lab, bi), (t,), 0,
                                    NUM_CLASSES)
        targets.append({
            "labels": np.asarray(labels, dtype=np.int64),
            "boxes_cxcywh": np.asarray(
                jnp.concatenate([centers, sizes], axis=-1), dtype=np.float32),
        })

    loss, loss_dict = detr_loss_forward(np.asarray(class_logits_all),
                                        np.asarray(boxes_all), targets)
    loss = jax.block_until_ready(loss)
    assert np.isfinite(float(loss))
    assert all(np.isfinite(v) for v in loss_dict.values())
    print("KERNEL_OK")
</pallas_src>

<mosaic_0001>
module attributes {stable_mosaic.version = 11 : i64} {
  func.func @detr_loss_kernel(%arg0: memref<2x16x128xf32, #tpu.memory_space<vmem>>, %arg1: memref<2x16x128xf32, #tpu.memory_space<vmem>>, %arg2: memref<2x8x128xf32, #tpu.memory_space<vmem>>, %arg3: memref<2x1x128xf32, #tpu.memory_space<vmem>>, %arg4: memref<2x8x128xf32, #tpu.memory_space<vmem>>) attributes {dimension_semantics = [], scalar_prefetch = 0 : i64, scratch_operands = 0 : i64, tpu.core_type = #tpu.core_type<tc>} {
    %c0 = arith.constant 0 : index
    %c0_0 = arith.constant 0 : index
    %c0_1 = arith.constant 0 : index
    %0 = vector.load %arg0[%c0, %c0_0, %c0_1] : memref<2x16x128xf32, #tpu.memory_space<vmem>>, vector<2x16x128xf32>
    %c0_2 = arith.constant 0 : index
    %c0_3 = arith.constant 0 : index
    %c0_4 = arith.constant 0 : index
    %1 = vector.load %arg1[%c0_2, %c0_3, %c0_4] : memref<2x16x128xf32, #tpu.memory_space<vmem>>, vector<2x16x128xf32>
    %cst = arith.constant dense<0xFF800000> : vector<2x16xf32>
    %2 = vector.multi_reduction <maximumf>, %0, %cst [2] : vector<2x16x128xf32> to vector<2x16xf32>
    %3 = vector.shape_cast %2 : vector<2x16xf32> to vector<2x16x1xf32>
    %4 = vector.broadcast %3 : vector<2x16x1xf32> to vector<2x16x128xf32>
    %5 = arith.subf %0, %4 : vector<2x16x128xf32>
    %6 = math.exp %5 : vector<2x16x128xf32>
    %cst_5 = arith.constant dense<0.000000e+00> : vector<2x16xf32>
    %7 = vector.multi_reduction <add>, %6, %cst_5 [2] : vector<2x16x128xf32> to vector<2x16xf32>
    %8 = vector.shape_cast %7 : vector<2x16xf32> to vector<2x16x1xf32>
    %9 = math.log %8 : vector<2x16x1xf32>
    %10 = vector.broadcast %9 : vector<2x16x1xf32> to vector<2x16x128xf32>
    %11 = arith.subf %5, %10 : vector<2x16x128xf32>
    %cst_6 = arith.constant 0.000000e+00 : f32
    %12 = vector.broadcast %cst_6 : f32 to vector<2x16x128xf32>
    %13 = arith.subf %12, %11 : vector<2x16x128xf32>
    %14 = arith.mulf %1, %13 : vector<2x16x128xf32>
    %cst_7 = arith.constant dense<0.000000e+00> : vector<2x16xf32>
    %15 = vector.multi_reduction <add>, %14, %cst_7 [2] : vector<2x16x128xf32> to vector<2x16xf32>
    %16 = vector.shape_cast %15 : vector<2x16xf32> to vector<2x16x1xf32>
    %cst_8 = arith.constant dense<0.000000e+00> : vector<2x1xf32>
    %17 = vector.multi_reduction <add>, %16, %cst_8 [1] : vector<2x16x1xf32> to vector<2x1xf32>
    %18 = vector.shape_cast %17 : vector<2x1xf32> to vector<2x1x1xf32>
    %cst_9 = arith.constant dense<0.000000e+00> : vector<2x16xf32>
    %19 = vector.multi_reduction <add>, %1, %cst_9 [2] : vector<2x16x128xf32> to vector<2x16xf32>
    %20 = vector.shape_cast %19 : vector<2x16xf32> to vector<2x16x1xf32>
    %cst_10 = arith.constant dense<0.000000e+00> : vector<2x1xf32>
    %21 = vector.multi_reduction <add>, %20, %cst_10 [1] : vector<2x16x1xf32> to vector<2x1xf32>
    %22 = vector.shape_cast %21 : vector<2x1xf32> to vector<2x1x1xf32>
    %23 = arith.divf %18, %22 : vector<2x1x1xf32>
    %c0_11 = arith.constant 0 : index
    %c0_12 = arith.constant 0 : index
    %c0_13 = arith.constant 0 : index
    %24 = vector.load %arg2[%c0_11, %c0_12, %c0_13] : memref<2x8x128xf32, #tpu.memory_space<vmem>>, vector<2x8x128xf32>
    %c0_14 = arith.constant 0 : index
    %c0_15 = arith.constant 0 : index
    %c0_16 = arith.constant 0 : index
    %25 = vector.load %arg3[%c0_14, %c0_15, %c0_16] : memref<2x1x128xf32, #tpu.memory_space<vmem>>, vector<2x1x128xf32>
    %26 = vector.extract_strided_slice %24 {offsets = [0, 0, 0], sizes = [2, 4, 128], strides = [1, 1, 1]} : vector<2x8x128xf32> to vector<2x4x128xf32>
    %27 = vector.extract_strided_slice %24 {offsets = [0, 4, 0], sizes = [2, 4, 128], strides = [1, 1, 1]} : vector<2x8x128xf32> to vector<2x4x128xf32>
    %28 = arith.subf %26, %27 : vector<2x4x128xf32>
    %29 = math.absf %28 : vector<2x4x128xf32>
    %30 = vector.broadcast %25 : vector<2x1x128xf32> to vector<2x4x128xf32>
    %31 = arith.mulf %29, %30 : vector<2x4x128xf32>
    %cst_17 = arith.constant dense<0.000000e+00> : vector<2x4xf32>
    %32 = vector.multi_reduction <add>, %31, %cst_17 [2] : vector<2x4x128xf32> to vector<2x4xf32>
    %33 = vector.shape_cast %32 : vector<2x4xf32> to vector<2x4x1xf32>
    %cst_18 = arith.constant dense<0.000000e+00> : vector<2x1xf32>
    %34 = vector.multi_reduction <add>, %33, %cst_18 [1] : vector<2x4x1xf32> to vector<2x1xf32>
    %35 = vector.shape_cast %34 : vector<2x1xf32> to vector<2x1x1xf32>
    %36 = vector.extract_strided_slice %26 {offsets = [0, 0, 0], sizes = [2, 1, 128], strides = [1, 1, 1]} : vector<2x4x128xf32> to vector<2x1x128xf32>
    %37 = vector.extract_strided_slice %26 {offsets = [0, 1, 0], sizes = [2, 1, 128], strides = [1, 1, 1]} : vector<2x4x128xf32> to vector<2x1x128xf32>
    %38 = vector.extract_strided_slice %26 {offsets = [0, 2, 0], sizes = [2, 1, 128], strides = [1, 1, 1]} : vector<2x4x128xf32> to vector<2x1x128xf32>
    %39 = vector.extract_strided_slice %26 {offsets = [0, 3, 0], sizes = [2, 1, 128], strides = [1, 1, 1]} : vector<2x4x128xf32> to vector<2x1x128xf32>
    %40 = vector.extract_strided_slice %27 {offsets = [0, 0, 0], sizes = [2, 1, 128], strides = [1, 1, 1]} : vector<2x4x128xf32> to vector<2x1x128xf32>
    %41 = vector.extract_strided_slice %27 {offsets = [0, 1, 0], sizes = [2, 1, 128], strides = [1, 1, 1]} : vector<2x4x128xf32> to vector<2x1x128xf32>
    %42 = vector.extract_strided_slice %27 {offsets = [0, 2, 0], sizes = [2, 1, 128], strides = [1, 1, 1]} : vector<2x4x128xf32> to vector<2x1x128xf32>
    %43 = vector.extract_strided_slice %27 {offsets = [0, 3, 0], sizes = [2, 1, 128], strides = [1, 1, 1]} : vector<2x4x128xf32> to vector<2x1x128xf32>
    %cst_19 = arith.constant 5.000000e-01 : f32
    %44 = vector.broadcast %cst_19 : f32 to vector<2x1x128xf32>
    %45 = arith.mulf %44, %38 : vector<2x1x128xf32>
    %46 = arith.subf %36, %45 : vector<2x1x128xf32>
    %cst_20 = arith.constant 5.000000e-01 : f32
    %47 = vector.broadcast %cst_20 : f32 to vector<2x1x128xf32>
    %48 = arith.mulf %47, %39 : vector<2x1x128xf32>
    %49 = arith.subf %37, %48 : vector<2x1x128xf32>
    %cst_21 = arith.constant 5.000000e-01 : f32
    %50 = vector.broadcast %cst_21 : f32 to vector<2x1x128xf32>
    %51 = arith.mulf %50, %38 : vector<2x1x128xf32>
    %52 = arith.addf %36, %51 : vector<2x1x128xf32>
    %cst_22 = arith.constant 5.000000e-01 : f32
    %53 = vector.broadcast %cst_22 : f32 to vector<2x1x128xf32>
    %54 = arith.mulf %53, %39 : vector<2x1x128xf32>
    %55 = arith.addf %37, %54 : vector<2x1x128xf32>
    %cst_23 = arith.constant 5.000000e-01 : f32
    %56 = vector.broadcast %cst_23 : f32 to vector<2x1x128xf32>
    %57 = arith.mulf %56, %42 : vector<2x1x128xf32>
    %58 = arith.subf %40, %57 : vector<2x1x128xf32>
    %cst_24 = arith.constant 5.000000e-01 : f32
    %59 = vector.broadcast %cst_24 : f32 to vector<2x1x128xf32>
    %60 = arith.mulf %59, %43 : vector<2x1x128xf32>
    %61 = arith.subf %41, %60 : vector<2x1x128xf32>
    %cst_25 = arith.constant 5.000000e-01 : f32
    %62 = vector.broadcast %cst_25 : f32 to vector<2x1x128xf32>
    %63 = arith.mulf %62, %42 : vector<2x1x128xf32>
    %64 = arith.addf %40, %63 : vector<2x1x128xf32>
    %cst_26 = arith.constant 5.000000e-01 : f32
    %65 = vector.broadcast %cst_26 : f32 to vector<2x1x128xf32>
    %66 = arith.mulf %65, %43 : vector<2x1x128xf32>
    %67 = arith.addf %41, %66 : vector<2x1x128xf32>
    %68 = arith.subf %52, %46 : vector<2x1x128xf32>
    %69 = arith.subf %55, %49 : vector<2x1x128xf32>
    %70 = arith.mulf %68, %69 : vector<2x1x128xf32>
    %71 = arith.subf %64, %58 : vector<2x1x128xf32>
    %72 = arith.subf %67, %61 : vector<2x1x128xf32>
    %73 = arith.mulf %71, %72 : vector<2x1x128xf32>
    %74 = arith.minimumf %52, %64 : vector<2x1x128xf32>
    %75 = arith.maximumf %46, %58 : vector<2x1x128xf32>
    %76 = arith.subf %74, %75 : vector<2x1x128xf32>
    %cst_27 = arith.constant 0.000000e+00 : f32
    %77 = vector.broadcast %cst_27 : f32 to vector<2x1x128xf32>
    %78 = arith.maximumf %76, %77 : vector<2x1x128xf32>
    %79 = arith.minimumf %55, %67 : vector<2x1x128xf32>
    %80 = arith.maximumf %49, %61 : vector<2x1x128xf32>
    %81 = arith.subf %79, %80 : vector<2x1x128xf32>
    %cst_28 = arith.constant 0.000000e+00 : f32
    %82 = vector.broadcast %cst_28 : f32 to vector<2x1x128xf32>
    %83 = arith.maximumf %81, %82 : vector<2x1x128xf32>
    %84 = arith.mulf %78, %83 : vector<2x1x128xf32>
    %85 = arith.addf %70, %73 : vector<2x1x128xf32>
    %86 = arith.subf %85, %84 : vector<2x1x128xf32>
    %cst_29 = arith.constant 1.000000e-07 : f32
    %87 = vector.broadcast %cst_29 : f32 to vector<2x1x128xf32>
    %88 = arith.addf %86, %87 : vector<2x1x128xf32>
    %89 = arith.divf %84, %88 : vector<2x1x128xf32>
    %90 = arith.maximumf %52, %64 : vector<2x1x128xf32>
    %91 = arith.minimumf %46, %58 : vector<2x1x128xf32>
    %92 = arith.subf %90, %91 : vector<2x1x128xf32>
    %93 = arith.maximumf %55, %67 : vector<2x1x128xf32>
    %94 = arith.minimumf %49, %61 : vector<2x1x128xf32>
    %95 = arith.subf %93, %94 : vector<2x1x128xf32>
    %96 = arith.mulf %92, %95 : vector<2x1x128xf32>
    %97 = arith.subf %96, %86 : vector<2x1x128xf32>
    %cst_30 = arith.constant 1.000000e-07 : f32
    %98 = vector.broadcast %cst_30 : f32 to vector<2x1x128xf32>
    %99 = arith.addf %96, %98 : vector<2x1x128xf32>
    %100 = arith.divf %97, %99 : vector<2x1x128xf32>
    %101 = arith.subf %89, %100 : vector<2x1x128xf32>
    %cst_31 = arith.constant 1.000000e+00 : f32
    %102 = vector.broadcast %cst_31 : f32 to vector<2x1x128xf32>
    %103 = arith.subf %102, %101 : vector<2x1x128xf32>
    %104 = arith.mulf %103, %25 : vector<2x1x128xf32>
    %cst_32 = arith.constant dense<0.000000e+00> : vector<2x1xf32>
    %105 = vector.multi_reduction <add>, %104, %cst_32 [2] : vector<2x1x128xf32> to vector<2x1xf32>
    %106 = vector.shape_cast %105 : vector<2x1xf32> to vector<2x1x1xf32>
    %cst_33 = arith.constant dense<0.000000e+00> : vector<2x1xf32>
    %107 = vector.multi_reduction <add>, %106, %cst_33 [1] : vector<2x1x1xf32> to vector<2x1xf32>
    %108 = vector.shape_cast %107 : vector<2x1xf32> to vector<2x1x1xf32>
    %cst_34 = arith.constant 5.000000e+00 : f32
    %109 = vector.broadcast %cst_34 : f32 to vector<2x1x1xf32>
    %110 = arith.mulf %109, %35 : vector<2x1x1xf32>
    %cst_35 = arith.constant 1.000000e+00 : f32
    %111 = vector.broadcast %cst_35 : f32 to vector<2x1x1xf32>
    %112 = arith.mulf %111, %23 : vector<2x1x1xf32>
    %113 = arith.addf %110, %112 : vector<2x1x1xf32>
    %cst_36 = arith.constant 2.000000e+00 : f32
    %114 = vector.broadcast %cst_36 : f32 to vector<2x1x1xf32>
    %115 = arith.mulf %114, %108 : vector<2x1x1xf32>
    %116 = arith.addf %113, %115 : vector<2x1x1xf32>
    %117 = vector.shape_cast %116 : vector<2x1x1xf32> to vector<1x2x1x1xf32>
    %cst_37 = arith.constant dense<0.000000e+00> : vector<1xf32>
    %118 = vector.multi_reduction <add>, %117, %cst_37 [1, 2, 3] : vector<1x2x1x1xf32> to vector<1xf32>
    %119 = vector.shape_cast %118 : vector<1xf32> to vector<1x1x1x1xf32>
    %120 = vector.extract %119[0, 0, 0, 0] : f32 from vector<1x1x1x1xf32>
    %121 = tpu.iota {dimensions = array<i32: 1>} : vector<2x8x128xi32>
    %122 = tpu.iota {dimensions = array<i32: 2>} : vector<2x8x128xi32>
    %c0_i32 = arith.constant 0 : i32
    %123 = vector.broadcast %c0_i32 : i32 to vector<2x8x128xi32>
    %124 = arith.cmpi eq, %121, %123 : vector<2x8x128xi32>
    %c0_i32_38 = arith.constant 0 : i32
    %125 = vector.broadcast %c0_i32_38 : i32 to vector<2x8x128xi32>
    %126 = arith.cmpi eq, %122, %125 : vector<2x8x128xi32>
    %127 = arith.andi %124, %126 : vector<2x8x128xi1>
    %cst_39 = arith.constant 0.000000e+00 : f32
    %128 = vector.shape_cast %35 : vector<2x1x1xf32> to vector<2x1x1xf32>
    %129 = vector.broadcast %128 : vector<2x1x1xf32> to vector<2x8x128xf32>
    %130 = vector.broadcast %cst_39 : f32 to vector<2x8x128xf32>
    %131 = arith.select %127, %129, %130 : vector<2x8x128xi1>, vector<2x8x128xf32>
    %c0_i32_40 = arith.constant 0 : i32
    %132 = vector.broadcast %c0_i32_40 : i32 to vector<2x8x128xi32>
    %133 = arith.cmpi eq, %121, %132 : vector<2x8x128xi32>
    %c1_i32 = arith.constant 1 : i32
    %134 = vector.broadcast %c1_i32 : i32 to vector<2x8x128xi32>
    %135 = arith.cmpi eq, %122, %134 : vector<2x8x128xi32>
    %136 = arith.andi %133, %135 : vector<2x8x128xi1>
    %cst_41 = arith.constant 0.000000e+00 : f32
    %137 = vector.shape_cast %108 : vector<2x1x1xf32> to vector<2x1x1xf32>
    %138 = vector.broadcast %137 : vector<2x1x1xf32> to vector<2x8x128xf32>
    %139 = vector.broadcast %cst_41 : f32 to vector<2x8x128xf32>
    %140 = arith.select %136, %138, %139 : vector<2x8x128xi1>, vector<2x8x128xf32>
    %141 = arith.addf %131, %140 : vector<2x8x128xf32>
    %c0_i32_42 = arith.constant 0 : i32
    %142 = vector.broadcast %c0_i32_42 : i32 to vector<2x8x128xi32>
    %143 = arith.cmpi eq, %121, %142 : vector<2x8x128xi32>
    %c2_i32 = arith.constant 2 : i32
    %144 = vector.broadcast %c2_i32 : i32 to vector<2x8x128xi32>
    %145 = arith.cmpi eq, %122, %144 : vector<2x8x128xi32>
    %146 = arith.andi %143, %145 : vector<2x8x128xi1>
    %cst_43 = arith.constant 0.000000e+00 : f32
    %147 = vector.shape_cast %23 : vector<2x1x1xf32> to vector<2x1x1xf32>
    %148 = vector.broadcast %147 : vector<2x1x1xf32> to vector<2x8x128xf32>
    %149 = vector.broadcast %cst_43 : f32 to vector<2x8x128xf32>
    %150 = arith.select %146, %148, %149 : vector<2x8x128xi1>, vector<2x8x128xf32>
    %151 = arith.addf %141, %150 : vector<2x8x128xf32>
    %c1_i32_44 = arith.constant 1 : i32
    %152 = vector.broadcast %c1_i32_44 : i32 to vector<2x8x128xi32>
    %153 = arith.cmpi eq, %121, %152 : vector<2x8x128xi32>
    %c0_i32_45 = arith.constant 0 : i32
    %154 = vector.broadcast %c0_i32_45 : i32 to vector<2x8x128xi32>
    %155 = arith.cmpi eq, %122, %154 : vector<2x8x128xi32>
    %156 = arith.andi %153, %155 : vector<2x8x128xi1>
    %cst_46 = arith.constant 0.000000e+00 : f32
    %157 = vector.broadcast %120 : f32 to vector<2x8x128xf32>
    %158 = vector.broadcast %cst_46 : f32 to vector<2x8x128xf32>
    %159 = arith.select %156, %157, %158 : vector<2x8x128xi1>, vector<2x8x128xf32>
    %160 = arith.addf %151, %159 : vector<2x8x128xf32>
    %c0_47 = arith.constant 0 : index
    %c0_48 = arith.constant 0 : index
    %c0_49 = arith.constant 0 : index
    %161 = vector.load %arg4[%c0_47, %c0_48, %c0_49] : memref<2x8x128xf32, #tpu.memory_space<vmem>>, vector<2x8x128xf32>
    tpu.vector_store %arg4[%c0_47, %c0_48, %c0_49], %160 {strides = array<i32>} : memref<2x8x128xf32, #tpu.memory_space<vmem>>, vector<2x8x128xf32>,
    return
  }
}

</mosaic_0001>

<bundles_post_ra>
// kernel: _detr_loss_device.1
= control target key start
LH: loop header
LB: loop body
LE: loop exit
PB: predicated region body
PF: predicated region fallthrough
CT: control target
= control target key end

     0   :  { %vm149_vm0 = vcmask 1043456   ;;  %vm264_vm1 = vcmask 1040384   ;;  %vm281_vm9 = vcmask 0   ;;  %s534_s0 = inlined_call_operand.vmem [shape: f32[2,16,128], index: 0, kind: input, shape index: {}]   ;;  %s535_s1 = inlined_call_operand.vmem [shape: f32[2,16,128], index: 1, kind: input, shape index: {}]   ;;  %s536_s2 = inlined_call_operand.vmem [shape: f32[2,8,128], index: 2, kind: input, shape index: {}]   ;;  %s537_s3 = inlined_call_operand.vmem [shape: f32[2,1,128], index: 3, kind: input, shape index: {}]   ;;  %s538_s4 = inlined_call_operand.vmem [shape: f32[2,8,128], index: 4, kind: output, shape index: {}]  }
   0x1   :  { %v17_v0 = vld [vmem:[%s534_s0] sm:$0xff]  ;;  %v19_v1 = vld [vmem:[%s534_s0 + $0x10] sm:$0xff]  ;;  %v18_v2 = vld [vmem:[%s534_s0 + $0x8] sm:$0xff] }
   0x2   :  { %25 = vmax.xlane.f32.xlu0 %v17_v0  ;;  %29 = vmax.xlane.f32.xlu1 %v19_v1  ;;  %v20_v3 = vld [vmem:[%s534_s0 + $0x18] sm:$0xff]  ;;  %v417_v20 = vld [vmem:[%s535_s1] sm:$0xff]  ;;  %v422_v21 = vld [vmem:[%s535_s1 + $0x8] sm:$0xff] }
   0x3   :  { %v429_v22 = vld [vmem:[%s535_s1 + $0x10] sm:$0xff]  ;;  %v434_v23 = vld [vmem:[%s535_s1 + $0x18] sm:$0xff]  ;;  %v441_v24 = vld [vmem:[%s536_s2] sm:$0xff] }
   0x4   :  { %v170_v25 = vmul.f32 0.5, %v441_v24  ;;  %v447_v26 = vld [vmem:[%s536_s2 + $0x8] sm:$0xff] }
   0x5   :  { %v171_v27 = vmul.f32 0.5, %v447_v26 }
   0x6   :  { %27 = vmax.xlane.f32.xlu0 %v18_v2  ;;  %31 = vmax.xlane.f32.xlu1 %v20_v3  ;;  %v174_v28 = vrot.slane %v170_v25, 2 }
   0x7   :  { %v175_v29 = vrot.slane %v171_v27, 2  ;;  %v127_v27 = vrot.slane %v441_v24, 4 }
   0x8   :  { %v178_v30 = vsub.f32 %v441_v24, %v174_v28  ;;  %v180_v31 = vadd.f32 %v174_v28, %v441_v24 }
   0x9   :  { %v179_v32 = vsub.f32 %v447_v26, %v175_v29  ;;  %v181_v33 = vadd.f32 %v175_v29, %v447_v26 }
   0xa   :  { %v194_v34 = vrot.slane %v180_v31, 4  ;;  %v202_v35 = vrot.slane %v178_v30, 4  ;;  %v182_v38 = vsub.f32 %v180_v31, %v178_v30 }
   0xb   :  { %v195_v36 = vrot.slane %v181_v33, 4  ;;  %v203_v37 = vrot.slane %v179_v32, 4  ;;  %v183_v41 = vsub.f32 %v181_v33, %v179_v32 }
   0xc   :  { %v198_v39 = vmin.f32 %v180_v31, %v194_v34  ;;  %v206_v40 = vmax.f32 %v178_v30, %v202_v35  ;;  %v186_v44 = vrot.slane %v182_v38, 1  ;;  %v236_v46 = vmax.f32 %v180_v31, %v194_v34 }
   0xd   :  { %v199_v42 = vmin.f32 %v181_v33, %v195_v36  ;;  %v207_v43 = vmax.f32 %v179_v32, %v203_v37  ;;  %v238_v47 = vmin.f32 %v178_v30, %v202_v35  ;;  %v187_v48 = vrot.slane %v183_v41, 1 }
   0xe   :  { %v208_v45 = vsub.f32 %v198_v39, %v206_v40  ;;  %v190_v50 = vmul.f32 %v186_v44, %v182_v38  ;;  %v237_v57 = vmax.f32 %v181_v33, %v195_v36  ;;  %v239_v58 = vmin.f32 %v179_v32, %v203_v37  ;;  %v123_v44 = vld [vmem:[%s537_s3] sm:$0x1] }
   0xf   :  { %v209_v49 = vsub.f32 %v199_v42, %v207_v43  ;;  %v240_v52 = vsub.f32 %v236_v46, %v238_v47  ;;  %v191_v53 = vmul.f32 %v187_v48, %v183_v41  ;;  %v131_v34 = vsub.f32 %v441_v24, %v127_v27 }
  0x10   :  { %v210_v51 = vmax.f32 %v208_v45, 0.0  ;;  %v222_v56 = vrot.slane %v190_v50, 4  ;;  %v128_v36 = vrot.slane %v447_v26, 4 }
  0x11   :  { %v211_v54 = vmax.f32 %v209_v49, 0.0  ;;  %v244_v59 = vrot.slane %v240_v52, 1  ;;  %v223_v61 = vrot.slane %v191_v53, 4  ;;  %v133_v47 = vand.u32 2147483647, %v131_v34 }
  0x12   :  { %v214_v55 = vrot.slane %v210_v51, 1  ;;  %v226_v63 = vadd.f32 %v222_v56, %v190_v50  ;;  %v132_v49 = vsub.f32 %v447_v26, %v128_v36 }
  0x13   :  { %v215_v60 = vrot.slane %v211_v54, 1 }
  0x14   :  { %v218_v62 = vmul.f32 %v214_v55, %v210_v51 }
  0x8f   :  { %v26_v4 = vpop.xlane.xlu0 %25  ;;  %v30_v5 = vpop.xlane.xlu1 %29 }
  0x90   :  { %v402_v6 = vsub.f32 %v17_v0, %v26_v4  ;;  %v404_v7 = vsub.f32 %v19_v1, %v30_v5  ;;  %v241_v0 = vsub.f32 %v237_v57, %v239_v58  ;;  %v248_v1 = vmul.f32 %v244_v59, %v240_v52 }
  0x91   :  { %v228_v4 = vsub.f32 %v226_v63, %v218_v62 }
  0x92   :  { %v37_v8 = vmul.f32 1.442695, %v402_v6  ;;  %v41_v9 = vmul.f32 1.442695, %v404_v7  ;;  %v245_v5 = vrot.slane %v241_v0, 1 }
  0x93   :  { %v28_v10 = vpop.xlane.xlu0 %27  ;;  %v32_v11 = vpop.xlane.xlu1 %31  ;;  %v250_v31 = vsub.f32 %v248_v1, %v228_v4 }
  0x94   :  { %337 = vpow2.f32 %v37_v8  ;;  %v408_v12 = vsub.f32 %v18_v2, %v28_v10  ;;  %v410_v13 = vsub.f32 %v20_v3, %v32_v11  ;;  %v219_v2 = vmul.f32 %v215_v60, %v211_v54  ;;  %v124_v54 = vld [vmem:[%s537_s3 + $0x1] sm:$0x1] }
  0x95   :  { %339 = vpow2.f32 %v41_v9  ;;  %v227_v3 = vadd.f32 %v223_v61, %v191_v53  ;;  %v252_v8 = vadd.f32 1e-07, %v248_v1  ;;  %v230_v10 = vadd.f32 1e-07, %v228_v4 }
  0x96   :  { %v39_v14 = vmul.f32 1.442695, %v408_v12  ;;  %v43_v15 = vmul.f32 1.442695, %v410_v13  ;;  %v249_v11 = vmul.f32 %v245_v5, %v241_v0  ;;  %v134_v60 = vand.u32 2147483647, %v132_v49 }
  0x97   :  { %v229_v9 = vsub.f32 %v227_v3, %v219_v2 }
  0x98   :  { %341 = vpow2.f32 %v39_v14 }
  0x99   :  { %343 = vpow2.f32 %v43_v15  ;;  %v231_v14 = vadd.f32 1e-07, %v229_v9  ;;  %v251_v37 = vsub.f32 %v249_v11, %v229_v9 }
  0x9a   :  { %345 = vrcp.f32 %v252_v8 }
  0x9b   :  { %347 = vrcp.f32 %v230_v10 }
  0x9e   :  { %v338_v16 = vpop.eup %337 }
  0x9f   :  { %45 = vadd.xlane.f32.xlu0 %v338_v16  ;;  %v340_v17 = vpop.eup %339  ;;  %v253_v16 = vadd.f32 1e-07, %v249_v11 }
  0xa2   :  { %v342_v18 = vpop.eup %341 }
  0xa3   :  { %49 = vadd.xlane.f32.xlu0 %v340_v17  ;;  %47 = vadd.xlane.f32.xlu1 %v342_v18  ;;  %v344_v19 = vpop.eup %343 }
  0xa4   :  { %v346_v28 = vpop.eup %345 }
  0xa5   :  { %v348_v29 = vpop.eup %347  ;;  %v255_v42 = vmul.f32 %v346_v28, %v250_v31 }
  0xa6   :  { %v233_v41 = vmul.f32 %v348_v29, %v218_v62 }
  0xa7   :  { %51 = vadd.xlane.f32.xlu1 %v344_v19  ;;  %95 = vadd.xlane.f32.xlu0 %v417_v20  ;;  %v137_v19 = vlaneseq }
  0xa8   :  { %v258_v55 = vsub.f32 %v233_v41, %v255_v42 }
  0xa9   :  { %v456_v30 = vshrl.u32 %v137_v19, 7 }
  0xaa   :  { %v260_v0 = vsub.f32 1.0, %v258_v55 }
  0xab   :  { %97 = vadd.xlane.f32.xlu1 %v422_v21  ;;  %99 = vadd.xlane.f32.xlu0 %v429_v22  ;;  %v462_v40 = vsub.s32 0, %v456_v30  ;;  %vm298_vm2 = vcmp.eq.s32.totalorder %v456_v30, 0  ;;  %vm323_vm10 = vcmp.eq.s32.totalorder %v456_v30, 1 }
  0xac   :  { %v262_v8 = vmul.f32 %v260_v0, %v123_v44 }
  0xad   :  { %v140_v53 = vrot.slane %v123_v44, %v462_v40  ;;  %v144_v61 = vrot.slane %v124_v54, %v462_v40 }
  0xae   :  { %v265_v9 = vsel %vm264_vm1, %v262_v8, 0.0 }
  0xaf   :  { %101 = vadd.xlane.f32.xlu1 %v434_v23  ;;  %v147_v63 = vmul.f32 %v140_v53, %v133_v47 }
  0xb1   :  { %v150_v5 = vsel %vm149_vm0, %v147_v63, 0.0 }
 0x12c   :  { %v46_v15 = vpop.xlane.xlu0 %45 }
 0x12d   :  { %349 = vlog2.f32 %v46_v15 }
 0x12e   :  { %351 = vrcp.f32 %v231_v14 }
 0x12f   :  { %353 = vrcp.f32 %v253_v16 }
 0x130   :  { %v48_v17 = vpop.xlane.xlu1 %47  ;;  %v50_v18 = vpop.xlane.xlu0 %49 }
 0x131   :  { %355 = vlog2.f32 %v48_v17 }
 0x132   :  { %357 = vlog2.f32 %v50_v18 }
 0x134   :  { %v52_v25 = vpop.xlane.xlu1 %51  ;;  %v96_v11 = vpop.xlane.xlu0 %95 }
 0x135   :  { %359 = vlog2.f32 %v52_v25 }
 0x137   :  { %v350_v32 = vpop.eup %349 }
 0x138   :  { %v54_v33 = vmul.f32 0.6931472, %v350_v32  ;;  %v352_v35 = vpop.eup %351  ;;  %v98_v10 = vpop.xlane.xlu1 %97 }
 0x139   :  { %v354_v38 = vpop.eup %353  ;;  %v235_v50 = vmul.f32 %v352_v35, %v219_v2  ;;  %v100_v15 = vpop.xlane.xlu0 %99  ;;  %v103_v16 = vadd.f32 %v98_v10, %v96_v11 }
 0x13a   :  { %v61_v39 = vsub.f32 %v402_v6, %v54_v33  ;;  %v257_v51 = vmul.f32 %v354_v38, %v251_v37 }
 0x13b   :  { %v356_v43 = vpop.eup %355  ;;  %v104_v17 = vrot.slane %v103_v16, 4 }
 0x13c   :  { %v358_v45 = vpop.eup %357  ;;  %v56_v46 = vmul.f32 0.6931472, %v356_v43  ;;  %v65_v24 = vsub.f32 0.0, %v61_v39  ;;  %v102_v14 = vpop.xlane.xlu1 %101 }
 0x13d   :  { %v58_v48 = vmul.f32 0.6931472, %v358_v45  ;;  %v105_v25 = vadd.f32 %v104_v17, %v103_v16 }
 0x13e   :  { %v69_v6 = vmul.f32 %v65_v24, %v417_v20  ;;  %v62_v52 = vsub.f32 %v408_v12, %v56_v46  ;;  %v259_v20 = vsub.f32 %v235_v50, %v257_v51  ;;  %v484_v50 = vand.u32 127, %v137_v19 }
 0x13f   :  { %v360_v56 = vpop.eup %359  ;;  %v63_v57 = vsub.f32 %v404_v7, %v58_v48  ;;  %v148_v7 = vmul.f32 %v144_v61, %v134_v60  ;;  %v106_v28 = vrot.slane %v105_v25, 2 }
 0x140   :  { %v60_v58 = vmul.f32 0.6931472, %v360_v56  ;;  %73 = vadd.xlane.f32.xlu0 %v69_v6  ;;  %v66_v59 = vsub.f32 0.0, %v62_v52  ;;  %v261_v3 = vsub.f32 1.0, %v259_v20  ;;  %vm303_vm3 = vcmp.eq.s32.totalorder %v484_v50, 1 }
 0x141   :  { %v67_v26 = vsub.f32 0.0, %v63_v57  ;;  %v107_v31 = vadd.f32 %v106_v28, %v105_v25  ;;  %vm299_vm4 = vcmp.eq.s32.totalorder %v484_v50, 0  ;;  %vm493_vm5 = vmand %vm298_vm2, %vm303_vm3  ;;  %vm317_vm6 = vcmp.eq.s32.totalorder %v484_v50, 2 }
 0x142   :  { %v70_v12 = vmul.f32 %v66_v59, %v422_v21  ;;  %v64_v62 = vsub.f32 %v410_v13, %v60_v58  ;;  %v153_v13 = vsel %vm149_vm0, %v148_v7, 0.0  ;;  %v263_v21 = vmul.f32 %v261_v3, %v124_v54  ;;  %vm503_vm7 = vmand %vm298_vm2, %vm299_vm4 }
 0x143   :  { %v71_v1 = vmul.f32 %v67_v26, %v429_v22  ;;  %v108_v34 = vrot.slane %v107_v31, 1  ;;  %vm511_vm8 = vmand %vm298_vm2, %vm317_vm6 }
 0x144   :  { %75 = vadd.xlane.f32.xlu1 %v70_v12  ;;  %v68_v2 = vsub.f32 0.0, %v64_v62  ;;  %v268_v22 = vsel %vm264_vm1, %v263_v21, 0.0  ;;  %vm324_vm11 = vmand %vm323_vm10, %vm299_vm4 }
 0x145   :  { %77 = vadd.xlane.f32.xlu0 %v71_v1  ;;  %v109_v39 = vadd.f32 %v108_v34, %v107_v31 }
 0x146   :  { %v72_v4 = vmul.f32 %v68_v2, %v434_v23  ;;  %v110_v23 = vadd.f32 %v102_v14, %v100_v15 }
 0x147   :  { %361 = vrcp.f32 %v109_v39 }
 0x148   :  { %79 = vadd.xlane.f32.xlu1 %v72_v4  ;;  %v111_v18 = vrot.slane %v110_v23, 4 }
 0x149   :  { %151 = vadd.xlane.f32.xlu0 %v150_v5 }
 0x14a   :  { %v112_v27 = vadd.f32 %v111_v18, %v110_v23 }
 0x14c   :  { %154 = vadd.xlane.f32.xlu1 %v153_v13  ;;  %v113_v29 = vrot.slane %v112_v27, 2 }
 0x14d   :  { %266 = vadd.xlane.f32.xlu0 %v265_v9 }
 0x14e   :  { %v114_v32 = vadd.f32 %v113_v29, %v112_v27 }
 0x150   :  { %269 = vadd.xlane.f32.xlu1 %v268_v22  ;;  %v115_v35 = vrot.slane %v114_v32, 1 }
 0x151   :  { %v362_v2 = vpop.eup %361 }
 0x152   :  { %v116_v42 = vadd.f32 %v115_v35, %v114_v32 }
 0x154   :  { %363 = vrcp.f32 %v116_v42 }
 0x15e   :  { %v364_v9 = vpop.eup %363 }
 0x1cd   :  { %v74_v33 = vpop.xlane.xlu0 %73 }
 0x1d1   :  { %v76_v36 = vpop.xlane.xlu1 %75 }
 0x1d2   :  { %v81_v37 = vadd.f32 %v76_v36, %v74_v33  ;;  %v78_v38 = vpop.xlane.xlu0 %77 }
 0x1d4   :  { %v82_v41 = vrot.slane %v81_v37, 4 }
 0x1d5   :  { %v80_v43 = vpop.xlane.xlu1 %79 }
 0x1d6   :  { %v83_v44 = vadd.f32 %v82_v41, %v81_v37  ;;  %v88_v45 = vadd.f32 %v80_v43, %v78_v38  ;;  %v152_v46 = vpop.xlane.xlu0 %151 }
 0x1d7   :  { %v156_v24 = vsel %vm149_vm0, %v152_v46, 0.0 }
 0x1d8   :  { %v84_v47 = vrot.slane %v83_v44, 2  ;;  %v89_v48 = vrot.slane %v88_v45, 4  ;;  %v157_v49 = vrot.slane %v156_v24, 4 }
 0x1d9   :  { %v155_v51 = vpop.xlane.xlu1 %154 }
 0x1da   :  { %v85_v6 = vadd.f32 %v84_v47, %v83_v44  ;;  %v90_v52 = vadd.f32 %v89_v48, %v88_v45  ;;  %v158_v53 = vadd.f32 %v157_v49, %v156_v24  ;;  %v163_v54 = vsel %vm149_vm0, %v155_v51, 0.0  ;;  %v267_v56 = vpop.xlane.xlu0 %266 }
 0x1db   :  { %v164_v55 = vrot.slane %v163_v54, 4  ;;  %v308_v20 = vrot.slane %v267_v56, %v462_v40  ;;  %v277_v11 = vmul.f32 2.0, %v267_v56 }
 0x1dc   :  { %v86_v57 = vrot.slane %v85_v6, 1  ;;  %v91_v58 = vrot.slane %v90_v52, 2  ;;  %v159_v59 = vrot.slane %v158_v53, 2 }
 0x1dd   :  { %v165_v26 = vadd.f32 %v164_v55, %v163_v54  ;;  %v270_v12 = vpop.xlane.xlu1 %269  ;;  %v313_v21 = vsel %vm493_vm5, %v308_v20, 0.0 }
 0x1de   :  { %v87_v19 = vadd.f32 %v86_v57, %v85_v6  ;;  %v92_v60 = vadd.f32 %v91_v58, %v90_v52  ;;  %v160_v61 = vadd.f32 %v159_v59, %v158_v53  ;;  %v312_v3 = vrot.slane %v270_v12, %v462_v40 }
 0x1df   :  { %v166_v62 = vrot.slane %v165_v26, 2  ;;  %v278_v28 = vmul.f32 2.0, %v270_v12 }
 0x1e0   :  { %v93_v0 = vrot.slane %v92_v60, 1  ;;  %v161_v1 = vrot.slane %v160_v61, 1  ;;  %v118_v13 = vmul.f32 %v362_v2, %v87_v19  ;;  %v314_v23 = vsel %vm493_vm5, %v312_v3, 0.0 }
 0x1e1   :  { %v167_v7 = vadd.f32 %v166_v62, %v165_v26 }
 0x1e2   :  { %v94_v5 = vadd.f32 %v93_v0, %v92_v60  ;;  %v162_v8 = vadd.f32 %v161_v1, %v160_v61  ;;  %v319_v25 = vsel %vm511_vm8, %v118_v13, 0.0 }
 0x1e3   :  { %v168_v22 = vrot.slane %v167_v7, 1 }
 0x1e4   :  { %v273_v10 = vmul.f32 5.0, %v162_v8  ;;  %v301_v14 = vsel %vm503_vm7, %v162_v8, 0.0  ;;  %v120_v16 = vmul.f32 %v364_v9, %v94_v5 }
 0x1e5   :  { %v169_v15 = vadd.f32 %v168_v22, %v167_v7  ;;  %v315_v17 = vadd.f32 %v313_v21, %v301_v14 }
 0x1e6   :  { %v275_v18 = vadd.f32 %v273_v10, %v118_v13  ;;  %v320_v35 = vsel %vm511_vm8, %v120_v16, 0.0 }
 0x1e7   :  { %v274_v27 = vmul.f32 5.0, %v169_v15  ;;  %v302_v29 = vsel %vm503_vm7, %v169_v15, 0.0  ;;  %v321_v31 = vadd.f32 %v319_v25, %v315_v17 }
 0x1e8   :  { %v316_v32 = vadd.f32 %v314_v23, %v302_v29  ;;  %v279_v33 = vadd.f32 %v277_v11, %v275_v18 }
 0x1e9   :  { %v276_v34 = vadd.f32 %v274_v27, %v120_v16 }
 0x1ea   :  { %v322_v36 = vadd.f32 %v320_v35, %v316_v32  ;;  %v282_v38 = vsel %vm281_vm9, %v279_v33, 0.0 }
 0x1eb   :  { %v280_v37 = vadd.f32 %v278_v28, %v276_v34 }
 0x1ed   :  { %v283_v39 = vsel %vm281_vm9, %v280_v37, 0.0 }
 0x1ee   :  { %v284_v41 = vadd.f32 %v283_v39, %v282_v38 }
 0x1f0   :  { %285 = vadd.xlane.f32.xlu0 %v284_v41 }
 0x27d   :  { %v286_v42 = vpop.xlane.xlu0 %285 }
 0x27e   :  { %v287_v43 = vrot.slane %v286_v42, 4 }
 0x280   :  { %v288_v44 = vadd.f32 %v287_v43, %v286_v42 }
 0x282   :  { %v289_v45 = vrot.slane %v288_v44, 2 }
 0x284   :  { %v290_v46 = vadd.f32 %v289_v45, %v288_v44 }
 0x286   :  { %v291_v24 = vrot.slane %v290_v46, 1 }
 0x288   :  { %v292_v47 = vadd.f32 %v291_v24, %v290_v46 }
 0x28a   :  { %335 = vpush %v292_v47 }
 0x2bb   :  { %s336_s3 = spop %335 }
 0x2bc   :  { %v325_v48 = vstv %s336_s3 }
 0x2bd   :  { %v326_v49 = vsel %vm324_vm11, %v325_v48, 0.0 }
 0x2be   :  { %v327_v51 = vadd.f32 %v326_v49, %v321_v31  ;;  %v328_v6 = vadd.f32 %v326_v49, %v322_v36 }
 0x2c0   :  { %329 = vst [vmem:[%s538_s4] sm:$0xff] %v327_v51  ;;  %330 = vst [vmem:[%s538_s4 + $0x8] sm:$0xff] %v328_v6 }

</bundles_post_ra>
